<compile_context>
chip_gen: v7x
topology: tpu7x:2x2x1
jax: 0.10.0
libtpu: 0.0.40
codegen_flags: <defaults>
</compile_context>

<pallas_src>
import functools

import jax
import jax.numpy as jnp
from jax.experimental import pallas as pl
from jax.experimental.pallas import tpu as pltpu


def _channel_gate_kernel(x_ref, w1t_ref, b1_ref, w2t_ref, b2_ref, o_ref, *, hw):
    # x_ref: (Bt, C, HW)   w1t: (C, Hid)  b1: (1, Hid)  w2t: (Hid, C)  b2: (1, C)
    bt = x_ref.shape[0]

    # Global pools over the flattened spatial (lane) axis.  The sum accumulates in f32
    # without binding an f32 copy of the whole block; max is exact in the input dtype
    # and only the tiny (Bt, C) result is widened.
    avg_pool = jnp.sum(x_ref[...], axis=2, dtype=jnp.float32) * jnp.float32(1.0 / hw)
    max_pool = jnp.max(x_ref[...], axis=2).astype(jnp.float32)          # (Bt, C)

    # Shared MLP, run once on both pooled vectors stacked along sublanes.
    pooled = jnp.concatenate([avg_pool, max_pool], axis=0)              # (2*Bt, C) f32
    h = jnp.dot(pooled, w1t_ref[...], preferred_element_type=jnp.float32) + b1_ref[...]
    h = jnp.maximum(h, 0.0)                                             # ReLU
    att2 = jnp.dot(h, w2t_ref[...], preferred_element_type=jnp.float32) + b2_ref[...]
    att = att2[:bt] + att2[bt:]                                         # mlp(avg)+mlp(max)

    scale = jax.nn.sigmoid(att)                                         # (Bt, C) f32 (EUP)
    # Re-read the block from the ref (vld slots are cheap, shortens live ranges) and
    # cast only the small scale tensor; the dominant store path stays in x's dtype.
    o_ref[...] = (x_ref[...] * scale.astype(o_ref.dtype)[:, :, None]).astype(o_ref.dtype)


def _pick_batch_block(B, row_bytes, target_block_bytes):
    """Pick the batch block size Bt."""
    bt = max(1, min(B, target_block_bytes // row_bytes))
    if B >= 4:
        # Keep at least 4 grid steps: both v7x TCs get work AND each still pipelines.
        bt = min(bt, max(1, B // 4))
    # Prefer an even grid length (megacore splits the 'parallel' axis across 2 TCs)
    # without shrinking the block below ~half its target size.
    for cand in range(bt, max(1, bt // 2) - 1, -1):
        if pl.cdiv(B, cand) % 2 == 0:
            return cand
    return bt


def channel_gate(x, w1, b1, w2, b2, *, target_block_bytes=4 << 20):
    """x: (B, C, H, W); w1: (Hid, C); b1: (Hid,); w2: (C, Hid); b2: (C,).

    Matches PyTorch ChannelGate.forward with pool_types=['avg', 'max'].
    """
    B, C, H, W = x.shape
    HW = H * W
    Hid = w1.shape[0]

    # Contiguous reshape: metadata-only, no extra HBM pass (unlike pad/slice).
    x_flat = x.reshape(B, C, HW)

    elt = jnp.dtype(x.dtype).itemsize
    row_bytes = C * HW * elt
    bt = _pick_batch_block(B, row_bytes, target_block_bytes)
    # Ragged last block is fine: pooling is per batch row, and out-of-bounds rows of the
    # padded final block are dropped on writeback.
    grid = pl.cdiv(B, bt)

    block_bytes = bt * row_bytes
    weight_bytes = 4 * (C * Hid + Hid + Hid * C + C)
    # 2x double-buffered input + 2x double-buffered output + ~1 in-flight block of
    # temporaries + resident weights + headroom; cap below v7x's 64 MiB physical VMEM.
    vmem_limit = int(min(max(5 * block_bytes + 2 * weight_bytes + (2 << 20), 16 << 20),
                         40 << 20))

    # Pre-transpose weights so the kernel does p @ Wt (PyTorch Linear is p @ W.T + b).
    w1t = jnp.asarray(w1.T, jnp.float32)                      # (C, Hid)
    w2t = jnp.asarray(w2.T, jnp.float32)                      # (Hid, C)
    b1_2d = jnp.asarray(b1, jnp.float32).reshape(1, Hid)
    b2_2d = jnp.asarray(b2, jnp.float32).reshape(1, C)

    kernel = functools.partial(_channel_gate_kernel, hw=HW)

    out_flat = pl.pallas_call(
        kernel,
        out_shape=jax.ShapeDtypeStruct((B, C, HW), x.dtype),
        grid_spec=pltpu.PrefetchScalarGridSpec(
            num_scalar_prefetch=0,
            grid=(grid,),
            in_specs=[
                pl.BlockSpec((bt, C, HW), lambda b: (b, 0, 0)),
                pl.BlockSpec((C, Hid), lambda b: (0, 0)),
                pl.BlockSpec((1, Hid), lambda b: (0, 0)),
                pl.BlockSpec((Hid, C), lambda b: (0, 0)),
                pl.BlockSpec((1, C), lambda b: (0, 0)),
            ],
            out_specs=pl.BlockSpec((bt, C, HW), lambda b: (b, 0, 0)),
        ),
        compiler_params=pltpu.CompilerParams(
            dimension_semantics=("parallel",),
            vmem_limit_bytes=vmem_limit,
        ),
    )(x_flat, w1t, b1_2d, w2t, b2_2d)

    return out_flat.reshape(B, C, H, W)


def channel_gate_ref(x, w1, b1, w2, b2):
    """Pure-JAX reference matching the PyTorch forward (pool_types=['avg', 'max'])."""
    B, C, H, W = x.shape
    xf = x.reshape(B, C, H * W)
    avg_pool = xf.mean(axis=2)                                # (B, C)
    max_pool = xf.max(axis=2)                                 # (B, C)

    def mlp(p):
        h = jnp.maximum(p @ w1.T + b1, 0.0)
        return h @ w2.T + b2

    att = mlp(avg_pool) + mlp(max_pool)
    scale = jax.nn.sigmoid(att)[:, :, None, None]
    return x * scale


if __name__ == "__main__":
    key = jax.random.PRNGKey(0)
    k_x, k_w1, k_b1, k_w2, k_b2 = jax.random.split(key, 5)

    # gate_channels=32, reduction_ratio=4 -> hidden=8; spatial 8x8; batch 4
    B, C, H, W = 4, 32, 8, 8
    Hid = C // 4

    x = jax.random.normal(k_x, (B, C, H, W), dtype=jnp.float32)
    w1 = jax.random.normal(k_w1, (Hid, C), dtype=jnp.float32) * 0.1
    b1 = jax.random.normal(k_b1, (Hid,), dtype=jnp.float32) * 0.1
    w2 = jax.random.normal(k_w2, (C, Hid), dtype=jnp.float32) * 0.1
    b2 = jax.random.normal(k_b2, (C,), dtype=jnp.float32) * 0.1

    out = jax.block_until_ready(channel_gate(x, w1, b1, w2, b2))

    ref = channel_gate_ref(x, w1, b1, w2, b2)
    assert out.shape == (B, C, H, W)
    assert jnp.allclose(out, ref, atol=1e-5, rtol=1e-5), "mismatch vs reference"

    print("KERNEL_OK")
</pallas_src>

<mosaic_0001>
module attributes {stable_mosaic.version = 11 : i64} {
  func.func @_channel_gate_kernel(%arg0: i32, %arg1: memref<1x32x64xf32, #tpu.memory_space<vmem>>, %arg2: memref<32x8xf32, #tpu.memory_space<vmem>>, %arg3: memref<1x8xf32, #tpu.memory_space<vmem>>, %arg4: memref<8x32xf32, #tpu.memory_space<vmem>>, %arg5: memref<1x32xf32, #tpu.memory_space<vmem>>, %arg6: memref<1x32x64xf32, #tpu.memory_space<vmem>>) attributes {dimension_semantics = [#tpu.dimension_semantics<parallel>], iteration_bounds = array<i64: 4>, scalar_prefetch = 0 : i64, scratch_operands = 0 : i64, tpu.core_type = #tpu.core_type<tc>, window_params = [{transform_indices = @transform_0, window_bounds = array<i64: 1, 32, 64>}, {pipeline_mode = #tpu.pipeline_mode<synchronous>, transform_indices = @transform_1, window_bounds = array<i64: 32, 8>}, {pipeline_mode = #tpu.pipeline_mode<synchronous>, transform_indices = @transform_2, window_bounds = array<i64: 1, 8>}, {pipeline_mode = #tpu.pipeline_mode<synchronous>, transform_indices = @transform_3, window_bounds = array<i64: 8, 32>}, {pipeline_mode = #tpu.pipeline_mode<synchronous>, transform_indices = @transform_4, window_bounds = array<i64: 1, 32>}, {transform_indices = @transform_5, window_bounds = array<i64: 1, 32, 64>}]} {
    %c0 = arith.constant 0 : index
    %c0_0 = arith.constant 0 : index
    %c0_1 = arith.constant 0 : index
    %0 = vector.load %arg1[%c0, %c0_0, %c0_1] : memref<1x32x64xf32, #tpu.memory_space<vmem>>, vector<1x32x64xf32>
    %cst = arith.constant dense<0.000000e+00> : vector<1x32xf32>
    %1 = vector.multi_reduction <add>, %0, %cst [2] : vector<1x32x64xf32> to vector<1x32xf32>
    %cst_2 = arith.constant 1.562500e-02 : f32
    %2 = vector.broadcast %cst_2 : f32 to vector<1x32xf32>
    %3 = arith.mulf %1, %2 : vector<1x32xf32>
    %c0_3 = arith.constant 0 : index
    %c0_4 = arith.constant 0 : index
    %c0_5 = arith.constant 0 : index
    %4 = vector.load %arg1[%c0_3, %c0_4, %c0_5] : memref<1x32x64xf32, #tpu.memory_space<vmem>>, vector<1x32x64xf32>
    %cst_6 = arith.constant dense<0xFF800000> : vector<1x32xf32>
    %5 = vector.multi_reduction <maximumf>, %4, %cst_6 [2] : vector<1x32x64xf32> to vector<1x32xf32>
    %6 = tpu.concatenate %3, %5 in 0 : vector<1x32xf32>, vector<1x32xf32> -> vector<2x32xf32>
    %c0_7 = arith.constant 0 : index
    %c0_8 = arith.constant 0 : index
    %7 = vector.load %arg2[%c0_7, %c0_8] : memref<32x8xf32, #tpu.memory_space<vmem>>, vector<32x8xf32>
    %cst_9 = arith.constant dense<0.000000e+00> : vector<2x8xf32>
    %8 = tpu.matmul %6, %7, %cst_9 {dimension_numbers = #tpu.dot_dimension_numbers<[1], [0], [0], [1], [0, 0, 1, 1], [], []>} : vector<2x32xf32>, vector<32x8xf32>, vector<2x8xf32> -> vector<2x8xf32>
    %c0_10 = arith.constant 0 : index
    %c0_11 = arith.constant 0 : index
    %9 = vector.load %arg3[%c0_10, %c0_11] : memref<1x8xf32, #tpu.memory_space<vmem>>, vector<1x8xf32>
    %10 = vector.broadcast %9 : vector<1x8xf32> to vector<2x8xf32>
    %11 = arith.addf %8, %10 : vector<2x8xf32>
    %cst_12 = arith.constant 0.000000e+00 : f32
    %12 = vector.broadcast %cst_12 : f32 to vector<2x8xf32>
    %13 = arith.maximumf %11, %12 : vector<2x8xf32>
    %c0_13 = arith.constant 0 : index
    %c0_14 = arith.constant 0 : index
    %14 = vector.load %arg4[%c0_13, %c0_14] : memref<8x32xf32, #tpu.memory_space<vmem>>, vector<8x32xf32>
    %cst_15 = arith.constant dense<0.000000e+00> : vector<2x32xf32>
    %15 = tpu.matmul %13, %14, %cst_15 {dimension_numbers = #tpu.dot_dimension_numbers<[1], [0], [0], [1], [0, 0, 1, 1], [], []>} : vector<2x8xf32>, vector<8x32xf32>, vector<2x32xf32> -> vector<2x32xf32>
    %c0_16 = arith.constant 0 : index
    %c0_17 = arith.constant 0 : index
    %16 = vector.load %arg5[%c0_16, %c0_17] : memref<1x32xf32, #tpu.memory_space<vmem>>, vector<1x32xf32>
    %17 = vector.broadcast %16 : vector<1x32xf32> to vector<2x32xf32>
    %18 = arith.addf %15, %17 : vector<2x32xf32>
    %19 = vector.extract_strided_slice %18 {offsets = [0, 0], sizes = [1, 32], strides = [1, 1]} : vector<2x32xf32> to vector<1x32xf32>
    %20 = vector.extract_strided_slice %18 {offsets = [1, 0], sizes = [1, 32], strides = [1, 1]} : vector<2x32xf32> to vector<1x32xf32>
    %21 = arith.addf %19, %20 : vector<1x32xf32>
    %22 = arith.negf %21 : vector<1x32xf32>
    %23 = math.exp %22 : vector<1x32xf32>
    %cst_18 = arith.constant 1.000000e+00 : f32
    %24 = vector.broadcast %cst_18 : f32 to vector<1x32xf32>
    %25 = arith.addf %24, %23 : vector<1x32xf32>
    %26 = arith.divf %24, %25 : vector<1x32xf32>
    %c0_19 = arith.constant 0 : index
    %c0_20 = arith.constant 0 : index
    %c0_21 = arith.constant 0 : index
    %27 = vector.load %arg1[%c0_19, %c0_20, %c0_21] : memref<1x32x64xf32, #tpu.memory_space<vmem>>, vector<1x32x64xf32>
    %28 = vector.shape_cast %26 : vector<1x32xf32> to vector<1x32x1xf32>
    %29 = vector.broadcast %28 : vector<1x32x1xf32> to vector<1x32x64xf32>
    %30 = arith.mulf %27, %29 : vector<1x32x64xf32>
    %c0_22 = arith.constant 0 : index
    %c0_23 = arith.constant 0 : index
    %c0_24 = arith.constant 0 : index
    %31 = vector.load %arg6[%c0_22, %c0_23, %c0_24] : memref<1x32x64xf32, #tpu.memory_space<vmem>>, vector<1x32x64xf32>
    tpu.vector_store %arg6[%c0_22, %c0_23, %c0_24], %30 {strides = array<i32>} : memref<1x32x64xf32, #tpu.memory_space<vmem>>, vector<1x32x64xf32>,
    return
  }
  func.func @transform_0(%arg0: i32) -> (i32, i32, i32) {
    %c0_i32 = arith.constant 0 : i32
    %c0_i32_0 = arith.constant 0 : i32
    %c0_i32_1 = arith.constant 0 : i32
    return %arg0, %c0_i32, %c0_i32_0 : i32, i32, i32
  }
  func.func @transform_1(%arg0: i32) -> (i32, i32) {
    %c0_i32 = arith.constant 0 : i32
    %c0_i32_0 = arith.constant 0 : i32
    %c0_i32_1 = arith.constant 0 : i32
    return %c0_i32, %c0_i32_0 : i32, i32
  }
  func.func @transform_2(%arg0: i32) -> (i32, i32) {
    %c0_i32 = arith.constant 0 : i32
    %c0_i32_0 = arith.constant 0 : i32
    %c0_i32_1 = arith.constant 0 : i32
    return %c0_i32, %c0_i32_0 : i32, i32
  }
  func.func @transform_3(%arg0: i32) -> (i32, i32) {
    %c0_i32 = arith.constant 0 : i32
    %c0_i32_0 = arith.constant 0 : i32
    %c0_i32_1 = arith.constant 0 : i32
    return %c0_i32, %c0_i32_0 : i32, i32
  }
  func.func @transform_4(%arg0: i32) -> (i32, i32) {
    %c0_i32 = arith.constant 0 : i32
    %c0_i32_0 = arith.constant 0 : i32
    %c0_i32_1 = arith.constant 0 : i32
    return %c0_i32, %c0_i32_0 : i32, i32
  }
  func.func @transform_5(%arg0: i32) -> (i32, i32, i32) {
    %c0_i32 = arith.constant 0 : i32
    %c0_i32_0 = arith.constant 0 : i32
    %c0_i32_1 = arith.constant 0 : i32
    return %arg0, %c0_i32, %c0_i32_0 : i32, i32, i32
  }
}

</mosaic_0001>

<bundles_post_ra>
// kernel: tpu_custom_call.1
= control target key start
LH: loop header
LB: loop body
LE: loop exit
PB: predicated region body
PF: predicated region fallthrough
CT: control target
= control target key end

     0   :  { %10 = vsyncpa [#allocation3], 0  ;;  %s1096_s0 = inlined_call_operand.hbm [shape: f32[4,32,64], index: 0, kind: input, shape index: {}]   ;;  %s1097_s1 = inlined_call_operand.vmem [shape: f32[32,8], index: 1, kind: input, shape index: {}]   ;;  %s1098_s2 = inlined_call_operand.vmem [shape: f32[1,8], index: 2, kind: input, shape index: {}]   ;;  %s1099_s3 = inlined_call_operand.vmem [shape: f32[8,32], index: 3, kind: input, shape index: {}]   ;;  %s1100_s4 = inlined_call_operand.vmem [shape: f32[1,32], index: 4, kind: input, shape index: {}]   ;;  %s1101_s5 = inlined_call_operand.hbm [shape: f32[4,32,64], index: 5, kind: output, shape index: {}]  }
   0x1   :  { %12 = vsyncpa [#allocation3 + $0x1], 0 }
   0x2   :  { %13 = vsyncpa [#allocation4], 0 }
   0x3   :  { %15 = vsyncpa [#allocation4 + $0x1], 0  ;;  %s870_s18 = smov 0   ;;  %s872_s19 = smov 0  }
   0x4   :  { %s874_s20 = smov 0   ;;  %s876_s21 = smov 0  }
   0x5 LB: > { %s891_s22 = sadd.s32 4294967295, %s829_s21   ;;  %s626_s23 = sadd.s32 4294967294, %s829_s21   ;;  %s829_s21 = sphi %s876_s21, %s1113_s21   ;;  %s825_s20 = sphi %s874_s20, %s1112_s20   ;;  %s821_s19 = sphi %s872_s19, %s1111_s19   ;;  %s817_s18 = sphi %s870_s18, %s1110_s18  }
   0x6   : > { %s895_s24 = sadd.s32 1, %s829_s21   ;;  %s28_s25 = sadd.s32 1, %s825_s20 }
   0x7   : > { %s25_s26 = ssub.s32 %s829_s21, %s895_s24  ;;  %p35_p0 = scmp.ne.s32.totalorder %s825_s20, %s821_s19 }
   0x8   : > { %p26_p1 = scmp.eq.s32.totalorder %s25_s26, 0  ;;  %p36_p2 = scmp.eq.s32.totalorder %s829_s21, 0 }
   0x9   : > { %p41_p3 = scmp.ne.s32.totalorder %s821_s19, %s817_s18  ;;  %p42_p4 = scmp.eq.s32.totalorder %s891_s22, 0 }
   0xa   : > { %s907_s27 = scalar_select %p26_p1, %s825_s20, %s28_s25  }
   0xb   : > { %p909_p5 = por %p36_p2, %p35_p0  ;;  %p913_p6 = por %p42_p4, %p41_p3 }
   0xc   : > { %p149_p7 = scmp.eq.s32.totalorder %s891_s22, 3  ;;  %p155_p8 = scmp.eq.s32.totalorder %s626_s23, 3 }
   0xd   : > { %p688_p9 = scmp.lt.s32.totalorder %s829_s21, 4  ;;  %s187_s7 = sand.u32 1, %s825_s20  }
   0xe   : > { %p919_p10 = por %p149_p7, %p35_p0  ;;  %p923_p11 = por %p155_p8, %p41_p3 }
   0xf   : > { %s645_s8 = sshll.u32 %s829_s21, 9  ;;  %s629_s9 = sshll.u32 %s187_s7, 5 }
  0x10   : > { %s1105_s30 = scalar_select %p919_p10, 1, 0 }
  0x11   : > { %s1106_s6 = scalar_select %p923_p11, 1, 0 }
  0x12   : > { %s932_s12 = scalar_lea.hbm %s1096_s0, %s645_s8  ;;  %s191_s13 = scalar_lea.vmem [#allocation2], %s629_s9 }
  0x13   : > { %s198_s14 = sshll.u32 %s191_s13, 4  ;;  %p936_p12 = pnand %p688_p9, %p909_p5  ;;  %s940_s14 = int_to_ptr.vmem [resolvable:$true] %s198_s14 }
  0x14   : > { %s942_s16 = scalar_lea.sflag [#allocation3], %s187_s7  ;;  %s733_s17 = scalar_lea.hbm %s932_s12, 512 }
  0x15   : > { %p734_p13 = scmp.ne.s32.totalorder %s932_s12, %s733_s17  ;;  %p735_p0 = pneg %p936_p12 }
  0x16   : > { %s738_s26 = scalar_lea.hbm %s1096_s0, 2048  ;;  %p739_p3 = scmp.lt.u32.totalorder %s932_s12, %s1096_s0 }
  0x17   : > { %p736_p1 = pnand %p735_p0, %p734_p13  ;;  %p740_p4 = scmp.lt.u32.totalorder %s738_s26, %s733_s17 }
  0x18   : > { %p742_p7 = scmp.lt.u32.totalorder %s733_s17, %s932_s12 }
  0x19   : > { %p737_p2 = pneg %p736_p1  ;;  %p741_p5 = por %p740_p4, %p739_p3 }
  0x1b   : > { %p743_p8 = por %p742_p7, %p741_p5 }
  0x1d   : > { %p744_p9 = pnand %p743_p8, %p737_p2 }
  0x1f   : > { %747 = shalt.err (!%p744_p9)
}
  0x20   : > { %s748_s7 = scalar_lea.vmem %s940_s14, 512  ;;  %s831_s9 = smov [#allocation2]  }
  0x21   : > { %p749_p13 = scmp.ne.s32.totalorder %s940_s14, %s748_s7  ;;  %s753_s10 = sshll.u32 %s831_s9, 4  ;;  %s754_s10 = int_to_ptr.vmem [resolvable:$false] %s753_s10 }
  0x22   : > { %s755_s11 = scalar_lea.vmem %s754_s10, 1024  ;;  %p756_p10 = scmp.lt.s32.totalorder %s940_s14, %s754_s10 }
  0x23   : > { %p751_p1 = pnand %p749_p13, %p735_p0  ;;  %p757_p3 = scmp.lt.s32.totalorder %s755_s11, %s748_s7 }
  0x25   : > { %p752_p11 = pneg %p751_p1  ;;  %p758_p4 = por %p757_p3, %p756_p10 }
  0x27   : > { %p759_p5 = pnand %p758_p4, %p752_p11 }
  0x29   : > { %762 = shalt.err (!%p759_p5)
}
  0x2a   : > { %s832_s13 = smov 128   ;;  %s833_s17 = smov 8  }
  0x2b   : > { %683 = dma.hbm_to_vmem [thread:$0]  (!%p936_p12), %s932_s12, 512, %s940_s14, %s942_s16, %s832_s13, %s832_s13, %s833_s17  }
  0x2c   : > { %p632_p0 = scmp.ge.s32.totalorder %s829_s21, 1  ;;  %p206_p2 = scmp.lt.s32.totalorder %s829_s21, 5 }
  0x2e   : > { %p207_p7 = pnand %p632_p0, %p206_p2 }
  0x2f   : > { %s973_s23 = sand.u32 (!%p207_p7), 1, %s821_s19  }
  0x30   : > { %210 = sbr.rel (%p207_p7) target bundleno = 819 (0x333), region = 40  ;;  %s633_s25 = sshll.u32 (!%p207_p7), %s973_s23, 5 }
  0x31   : > { %s213_s26 = scalar_lea.sflag (!%p207_p7), [#allocation3], %s973_s23  ;;  %s216_s28 = scalar_lea.vmem (!%p207_p7), [#allocation2], %s633_s25 }
  0x37   : > { %808 = dma.done.wait (%p913_p6), %s213_s26, 512  }
  0x38   : > { %810 = vsyncadd (%p913_p6), %s213_s26, 4294966784  ;;  %vm247_vm0 = vcmask 523264   ;;  %v983_v0 = vld [vmem:[%s216_s28 + $0x10] sm:$0xff]  ;;  %v985_v1 = vld [vmem:[%s216_s28] sm:$0xff]  ;;  %v834_v15 = vmov 0.0|0.0   ;;  %vm835_vm1 = vmmov 0   ;;  %v280_v20 = vlaneseq }
  0x39   : > { %v987_v2 = vld [vmem:[%s216_s28 + $0x18] sm:$0xff]  ;;  %v254_v3 = vsel %vm247_vm0, %v983_v0, 0.0  ;;  %v248_v4 = vsel %vm247_vm0, %v985_v1, 0.0  ;;  %v993_v5 = vld [vmem:[%s216_s28 + $0x8] sm:$0xff]  ;;  %v264_v9 = vsel %vm247_vm0, %v985_v1, -inf  ;;  %v270_v10 = vsel %vm247_vm0, %v983_v0, -inf  ;;  %670 = vmatprep.subr.bf16.mxu0 %v834_v15 }
  0x3a   : > { %255 = vadd.xlane.f32.xlu1 %v254_v3  ;;  %249 = vadd.xlane.f32.xlu0 %v248_v4  ;;  %v257_v6 = vsel %vm247_vm0, %v987_v2, 0.0  ;;  %v251_v7 = vsel %vm247_vm0, %v993_v5, 0.0  ;;  %v267_v8 = vsel %vm247_vm0, %v993_v5, -inf  ;;  %v273_v11 = vsel %vm247_vm0, %v987_v2, -inf  ;;  %v334_v12 = vld [vmem:[%s1097_s1] sm:$0xff]  ;;  %v335_v13 = vld [vmem:[%s1097_s1 + $0x8] sm:$0xff] }
  0x3b   : > { %v671_v14 = vpack.c.bf16 %v335_v13, %v334_v12  ;;  %v336_v16 = vld [vmem:[%s1097_s1 + $0x10] sm:$0xff]  ;;  %v337_v17 = vld [vmem:[%s1097_s1 + $0x18] sm:$0xff]  ;;  %v836_v19 = vmov 0.0   ;;  %v281_v21 = vand.u32 127, %v280_v20  ;;  %v1019_v23 = vshrl.u32 %v280_v20, 7  ;;  %v420_v57 = vld [vmem:[%s1099_s3] sm:$0xff] }
  0x3c   : > { %v674_v18 = vpack.c.bf16 %v337_v17, %v336_v16  ;;  %662 = vmatprep.mubr.msk.f32.mxu0 %vm835_vm1, %v836_v19  ;;  %665 = vmatprep.subr.mxu1 %v836_v19  ;;  %vm291_vm2 = vcmask 130112   ;;  %vm298_vm3 = vcmask 195712   ;;  %vm305_vm4 = vcmask 261312   ;;  %v635_v58 = vld [vmem:[%s1098_s2] ss:$0 sm:$0xff]  ;;  %s242_s29 = scalar_lea.vmem [#allocation5], %s633_s25 }
  0x3d   : > { %672 = vmatpush3.bf16.msra.mxu0 %v671_v14  ;;  %667 = vmatprep.mubr.msk.f32.mxu1 %vm835_vm1, %v836_v19  ;;  %v286_v22 = vadd.s32 4294967288, %v281_v21  ;;  %v293_v26 = vadd.s32 4294967280, %v281_v21  ;;  %v284_v28 = vsub.s32 %v281_v21, %v1019_v23  ;;  %v300_v30 = vadd.s32 4294967272, %v281_v21  ;;  %v637_v63 = vld [vmem:[%s1100_s4] ss:$0 sm:$0xff]  ;;  %s553_s12 = sshll.u32 %s242_s29, 4  ;;  %s1045_s12 = int_to_ptr.vmem [resolvable:$true] %s553_s12 }
  0x3e   : > { %258 = vadd.xlane.f32.xlu1 %v257_v6  ;;  %252 = vadd.xlane.f32.xlu0 %v251_v7  ;;  %vm332_vm5 = vcmask 1040384   ;;  %vm345_vm6 = vcmask 261120   ;;  %vm428_vm7 = vcmask 64512   ;;  %v514_v12 = vsub.s32 0, %v1019_v23  ;;  %s646_s14 = sshll.u32 %s891_s22, 9  ;;  %s540_s8 = scalar_lea.sflag [#allocation4], %s973_s23 }
  0x3f   : > { %673 = vmatprep.subr.bf16.mxu0 %v834_v15  ;;  %v289_v27 = vsub.s32 %v286_v22, %v1019_v23  ;;  %v296_v34 = vsub.s32 %v293_v26, %v1019_v23  ;;  %v303_v38 = vsub.s32 %v300_v30, %v1019_v23  ;;  %666 = vmatpush3.msra.mxu1 %v420_v57  ;;  %s1051_s16 = scalar_lea.hbm %s1101_s5, %s646_s14  ;;  %s763_s7 = scalar_lea.vmem %s1045_s12, 512 }
  0x40   : > { %p764_p6 = scmp.ne.s32.totalorder %s1045_s12, %s763_s7  ;;  %p1108_p10 = scmp.ne.s32.totalorder %s1105_s30, 0 }
  0x41   : > { %675 = vmatpush3.bf16.msra.mxu0 %v674_v18  ;;  %s837_s22 = smov [#allocation5]  }
  0x42   : > { %268 = vmax.xlane.f32.xlu1 %v267_v8  ;;  %265 = vmax.xlane.f32.xlu0 %v264_v9  ;;  %p765_p11 = pnand %p764_p6, %p1108_p10  ;;  %s767_s9 = sshll.u32 %s837_s22, 4  ;;  %s768_s9 = int_to_ptr.vmem [resolvable:$false] %s767_s9 }
  0x43   : > { %s769_s10 = scalar_lea.vmem %s768_s9, 1024  ;;  %p770_p8 = scmp.lt.s32.totalorder %s1045_s12, %s768_s9 }
  0x44   : > { %p766_p12 = pneg %p765_p11  ;;  %p771_p9 = scmp.lt.s32.totalorder %s769_s10, %s763_s7 }
  0x46   : > { %271 = vmax.xlane.f32.xlu0 %v270_v10  ;;  %274 = vmax.xlane.f32.xlu1 %v273_v11  ;;  %p772_p13 = por %p771_p9, %p770_p8 }
  0x48   : > { %p773_p1 = pnand %p772_p13, %p766_p12 }
  0xc7   : > { %v256_v24 = vpop.xlane.xlu1 %255  ;;  %v250_v25 = vpop.xlane.xlu0 %249 }
  0xc8   : > { %v260_v29 = vmul.f32 0.015625, %v250_v25  ;;  %v262_v35 = vmul.f32 0.015625, %v256_v24 }
  0xca   : > { %v285_v37 = vrot.slane %v260_v29, %v284_v28  ;;  %v297_v45 = vrot.slane %v262_v35, %v296_v34 }
  0xcb   : > { %v259_v31 = vpop.xlane.xlu1 %258  ;;  %v253_v32 = vpop.xlane.xlu0 %252 }
  0xcc   : > { %v261_v33 = vmul.f32 0.015625, %v253_v32  ;;  %v263_v39 = vmul.f32 0.015625, %v259_v31 }
  0xce   : > { %v290_v36 = vrot.slane %v261_v33, %v289_v27  ;;  %v304_v46 = vrot.slane %v263_v39, %v303_v38 }
  0xcf   : > { %v269_v40 = vpop.xlane.xlu1 %268  ;;  %v266_v41 = vpop.xlane.xlu0 %265 }
  0xd0   : > { %v292_v42 = vsel %vm291_vm2, %v290_v36, %v285_v37  ;;  %v319_v43 = vrot.slane %v269_v40, %v289_v27  ;;  %v315_v44 = vrot.slane %v266_v41, %v284_v28 }
  0xd1   : > { %v299_v51 = vsel %vm298_vm3, %v297_v45, %v292_v42 }
  0xd2   : > { %v320_v52 = vsel %vm291_vm2, %v319_v43, %v315_v44  ;;  %v306_v55 = vsel %vm305_vm4, %v304_v46, %v299_v51 }
  0xd3   : > { %v272_v47 = vpop.xlane.xlu0 %271  ;;  %v275_v48 = vpop.xlane.xlu1 %274 }
  0xd4   : > { %v324_v49 = vrot.slane %v272_v47, %v296_v34  ;;  %v329_v50 = vrot.slane %v275_v48, %v303_v38 }
  0xd6   : > { %v325_v53 = vsel %vm298_vm3, %v324_v49, %v320_v52 }
  0xd7   : > { %v330_v54 = vsel %vm305_vm4, %v329_v50, %v325_v53 }
  0xd8   : > { %v333_v56 = vsel %vm332_vm5, %v306_v55, %v330_v54 }
  0xd9   : > { %663 = vmatmul.mubr.msk.f32.vlgmr.msra.gmra.mrb[0].mxu0 %vm345_vm6, %v333_v56 }
 0x1ac   : > { %v415_v59 = vpop.f32.mrb[0].mxu0 }
 0x1ad   : > { %v416_v60 = vadd.f32 %v635_v58, %v415_v59  ;;  %v664_v61 = vpop.f32.mrb[1].mxu0 }
 0x1af   : > { %v419_v62 = vmax.f32 %v416_v60, 0.0 }
 0x1b1   : > { %668 = vmatmul.mubr.msk.f32.vlgmr.msra.gmra.mrb[0].mxu1 %vm428_vm7, %v419_v62 }
 0x284   : > { %v498_v3 = vpop.f32.mrb[0].mxu1 }
 0x285   : > { %v499_v4 = vadd.f32 %v637_v63, %v498_v3  ;;  %v669_v6 = vpop.f32.mrb[1].mxu1 }
 0x287   : > { %v503_v7 = vrot.slane %v499_v4, 1 }
 0x289   : > { %v505_v8 = vadd.f32 %v503_v7, %v499_v4 }
 0x28b   : > { %v639_v9 = vmul.f32 -1.442695, %v505_v8 }
 0x28d   : > { %729 = vpow2.f32 %v639_v9 }
 0x297   : > { %v730_v10 = vpop.eup %729 }
 0x298   : > { %v509_v11 = vadd.f32 1.0, %v730_v10 }
 0x29a   : > { %731 = vrcp.f32 %v509_v11 }
 0x2a4   : > { %v732_v13 = vpop.eup %731 }
 0x2a5   : > { %v515_v14 = vrot.slane %v732_v13, %v514_v12 }
 0x2a7   : > { %521 = vbcast.lane.b32.xlu1 %v515_v14, 264  ;;  %517 = vbcast.lane.b32.xlu0 %v515_v14, 256 }
 0x2ab   : > { %525 = vbcast.lane.b32.xlu1 %v515_v14, 272 }
 0x2af   : > { %529 = vbcast.lane.b32.xlu1 %v515_v14, 280 }
 0x319   : > { %v522_v15 = vpop.permute.xlu1 %521  ;;  %v518_v16 = vpop.permute.xlu0 %517 }
 0x31a   : > { %v532_v17 = vmul.f32 %v522_v15, %v993_v5  ;;  %v531_v18 = vmul.f32 %v518_v16, %v985_v1 }
 0x31c   : > { %536 = vst.msk [vmem:[%s242_s29 + $0x8] sm:$0xff] %vm247_vm0, %v532_v17  ;;  %535 = vst.msk [vmem:[%s242_s29] sm:$0xff] %vm247_vm0, %v531_v18 }
 0x31d   : > { %v526_v19 = vpop.permute.xlu1 %525 }
 0x31e   : > { %v533_v20 = vmul.f32 %v526_v19, %v983_v0 }
 0x320   : > { %537 = vst.msk [vmem:[%s242_s29 + $0x10] sm:$0xff] %vm247_vm0, %v533_v20 }
 0x321   : > { %v530_v1 = vpop.permute.xlu1 %529 }
 0x322   : > { %v534_v5 = vmul.f32 %v530_v1, %v987_v2 }
 0x324   : > { %538 = vst.msk [vmem:[%s242_s29 + $0x18] sm:$0xff] %vm247_vm0, %v534_v5 }
 0x325   : > { %776 = shalt.err (!%p773_p1)
}
 0x326   : > { %s777_s11 = scalar_lea.hbm %s1051_s16, 512  ;;  %s781_s26 = scalar_lea.hbm %s1101_s5, 2048 }
 0x327   : > { %p778_p3 = scmp.ne.s32.totalorder %s1051_s16, %s777_s11  ;;  %p782_p0 = scmp.lt.u32.totalorder %s1051_s16, %s1101_s5 }
 0x328   : > { %p783_p2 = scmp.lt.u32.totalorder %s781_s26, %s777_s11  ;;  %p785_p6 = scmp.lt.u32.totalorder %s777_s11, %s1051_s16 }
 0x329   : > { %p779_p4 = pnand %p778_p3, %p1108_p10 }
 0x32a   : > { %p784_p7 = por %p783_p2, %p782_p0 }
 0x32b   : > { %p780_p5 = pneg %p779_p4 }
 0x32c   : > { %p786_p11 = por %p785_p6, %p784_p7 }
 0x32e   : > { %p787_p12 = pnand %p786_p11, %p780_p5 }
 0x330   : > { %790 = shalt.err (!%p787_p12)
}
 0x331   : > { %s838_s14 = smov 128   ;;  %s839_s15 = smov 8  }
 0x332   : > { %678 = dma.vmem_to_hbm [thread:$0]  (%p1108_p10), %s1045_s12, 512, %s1051_s16, %s540_s8, %s838_s14, %s838_s14, %s839_s15  }
 0x333 PF: > { %p689_p8 = scmp.ge.s32.totalorder %s829_s21, 2  ;;  %s568_s25 = sand.u32 1, %s817_s18  }
 0x334   : > { %p1109_p9 = scmp.ne.s32.totalorder %s1106_s6, 0  ;;  %s569_s7 = scalar_lea.sflag [#allocation4], %s568_s25 }
 0x336   : > { %p685_p13 = pnand %p689_p8, %p1109_p9 }
 0x338   : > { %812 = dma.done.wait (!%p685_p13), %s569_s7, 512  }
 0x339   : > { %814 = vsyncadd (!%p685_p13), %s569_s7, 4294966784  ;;  %p18_p1 = scmp.ge.s32.totalorder %s895_s24, 6   ;;  %s1110_s18 = smov %s821_s19 }
 0x33a   : > { %s1111_s19 = smov %s825_s20  ;;  %s1112_s20 = smov %s907_s27 }
 0x33b   : > { %s1113_s21 = smov %s895_s24  ;;  %20 = sbr.rel (!%p18_p1) target bundleno = 5 (0x5), region = 85 }
 0x342   :  { %574 = vsyncpa [#allocation3], 1 }
 0x343   :  { %576 = vsyncpa [#allocation3 + $0x1], 1 }
 0x344   :  { %577 = vsyncpa [#allocation4], 1 }
 0x345   :  { %579 = vsyncpa [#allocation4 + $0x1], 1 }

</bundles_post_ra>
